<compile_context>
chip_gen: v7x
topology: tpu7x:2x2x1
jax: 0.10.0
libtpu: 0.0.40
codegen_flags: <defaults>
</compile_context>

<pallas_src>
import functools

import jax
import jax.numpy as jnp
from jax.experimental import pallas as pl
from jax.experimental.pallas import tpu as pltpu

EPS = 1e-5
NEG_SLOPE = 0.2


def _leaky_relu(x):
    return jnp.where(x >= 0, x, NEG_SLOPE * x)


# ---------------------------------------------------------------------------
# Kernel: two MXU matmuls (BN already folded into the weights) + VPU tail.
# ---------------------------------------------------------------------------
def decoder_kernel(h_ref, w1_ref, b1_ref, w2_ref, b2_ref, w3_ref, b3_ref,
                   o_ref, *, mm_dtype):
    # --- fc1 + LeakyReLU(0.2) ---
    x = h_ref[...].astype(mm_dtype)                                   # (TB, C)
    z = jnp.dot(x, w1_ref[...], preferred_element_type=jnp.float32)   # MXU
    z = _leaky_relu(z + b1_ref[...])                                  # f32 VPU

    # --- fc2 (BN1 folded in) + LeakyReLU(0.2) ---
    z = jnp.dot(z.astype(mm_dtype), w2_ref[...],
                preferred_element_type=jnp.float32)                   # MXU
    z = _leaky_relu(z + b2_ref[...])                                  # f32 VPU

    # --- fc3 (BN2 folded in), output width 1: VPU mul + lane reduce ---
    out = jnp.sum(z * w3_ref[...], axis=-1, keepdims=True) + b3_ref[...]
    o_ref[...] = out                                                  # (TB, 1)


# ---------------------------------------------------------------------------
# Wrapper
# ---------------------------------------------------------------------------
def _fold_bn_into_next_linear(w_next_t, b_next, gamma, beta, rm, rv):
    """Fold eval-mode BN (y = x*a + c) into the following Linear (in,out) weight."""
    a = gamma * jax.lax.rsqrt(rv + EPS)
    c = beta - rm * a
    w_folded = w_next_t * a[:, None]          # scale input rows of (in, out)
    b_folded = b_next + c @ w_next_t
    return w_folded, b_folded


def _pick_tile_b(n):
    """Largest multiple of 8 that divides n, gives >= 2 grid steps, <= 512."""
    if n % 8 != 0:
        return n
    best = None
    t = 8
    while t <= min(n, 512):
        if n % t == 0 and (n // t) >= 2:
            best = t
        t += 8
    return best if best is not None else n


def decoder_forward(h, params, *, tile_b=None, mm_dtype=jnp.bfloat16):
    """h: (N, C) float32. Returns (N,) float32 (matches PyTorch squeeze(-1))."""
    N, C = h.shape
    C1, C2 = C // 2, C // 4

    (w1, b1, g1, bt1, rm1, rv1,
     w2, b2, g2, bt2, rm2, rv2,
     w3, b3) = [jnp.asarray(p, jnp.float32) for p in params]

    # PyTorch (out, in) -> (in, out) so the kernel does plain x @ W.
    w1t, w2t, w3t = w1.T, w2.T, w3.T
    # Fold eval-mode BatchNorms into the next Linear (exact in eval mode).
    w2t, b2 = _fold_bn_into_next_linear(w2t, b2, g1, bt1, rm1, rv1)
    w3t, b3 = _fold_bn_into_next_linear(w3t, b3, g2, bt2, rm2, rv2)

    if tile_b is None:
        tile_b = _pick_tile_b(N)
    assert N % tile_b == 0, "tile_b must divide N"
    assert tile_b == N or tile_b % 8 == 0, "tile_b must be a multiple of 8"
    grid = (N // tile_b,)

    def row(v):  # per-feature vector -> (1, C) f32 row (broadcast over batch)
        return v.reshape(1, -1).astype(jnp.float32)

    args = (
        h.astype(jnp.float32),                    # f32 DMA; cast to bf16 in-kernel
        w1t.astype(mm_dtype), row(b1),
        w2t.astype(mm_dtype), row(b2),
        row(w3t[:, 0]),                           # fc3 weight as (1, C2) f32 row
        b3.reshape(1, 1).astype(jnp.float32),
    )

    def const(shape):
        # full-array block, same block index for every grid step
        return pl.BlockSpec(shape, lambda i: tuple(0 for _ in shape))

    in_specs = [
        pl.BlockSpec((tile_b, C), lambda i: (i, 0)),   # h tile
        const((C, C1)), const((1, C1)),                # w1, b1
        const((C1, C2)), const((1, C2)),               # w2', b2'
        const((1, C2)), const((1, 1)),                 # w3' row, b3'
    ]

    # --- VMEM accounting (double-buffered inputs) & cost estimate ---
    mm_bytes = jnp.dtype(mm_dtype).itemsize
    needed = (2 * tile_b * C * 4                       # h tile (f32, 2 bufs)
              + 2 * (C * C1 + C1 * C2) * mm_bytes      # weights (2 bufs)
              + 2 * (C1 + C2 + C2 + 1) * 4             # bias/row vectors
              + 2 * tile_b * 4                         # output tile
              + 4 * tile_b * max(C1, C2) * 4           # live intermediates
              + (1 << 20))                             # slack
    vmem_limit = int(min(max(2 * needed, 32 << 20), 56 << 20))

    flops = 2 * N * (C * C1 + C1 * C2 + C2)
    bytes_accessed = (N * C * 4 + (C * C1 + C1 * C2) * mm_bytes
                      + (C1 + C2 + C2 + 1) * 4 + N * 4)

    out = pl.pallas_call(
        functools.partial(decoder_kernel, mm_dtype=mm_dtype),
        out_shape=jax.ShapeDtypeStruct((N, 1), jnp.float32),
        grid=grid,
        in_specs=in_specs,
        out_specs=pl.BlockSpec((tile_b, 1), lambda i: (i, 0)),
        compiler_params=pltpu.CompilerParams(
            dimension_semantics=("parallel",),
            vmem_limit_bytes=vmem_limit),
        cost_estimate=pl.CostEstimate(
            flops=flops, transcendentals=0, bytes_accessed=bytes_accessed),
    )(*args)

    return out[:, 0]  # squeeze(dim=-1)


# ---------------------------------------------------------------------------
# Deterministic parameter construction (mirrors Decoder.__init__ /
# reset_parameters: xavier_uniform_ weights, zero biases, default BatchNorm1d
# state gamma=1, beta=0, running_mean=0, running_var=1).
# ---------------------------------------------------------------------------
def xavier_uniform(key, fan_out, fan_in):
    bound = jnp.sqrt(6.0 / (fan_in + fan_out))
    return jax.random.uniform(key, (fan_out, fan_in), jnp.float32, -bound, bound)


def make_params(key, in_channels):
    C, C1, C2 = in_channels, in_channels // 2, in_channels // 4
    k1, k2, k3 = jax.random.split(key, 3)
    w1 = xavier_uniform(k1, C1, C)
    w2 = xavier_uniform(k2, C2, C1)
    w3 = xavier_uniform(k3, 1, C2)
    zeros = lambda n: jnp.zeros((n,), jnp.float32)
    ones = lambda n: jnp.ones((n,), jnp.float32)
    return (
        w1, zeros(C1), ones(C1), zeros(C1), zeros(C1), ones(C1),
        w2, zeros(C2), ones(C2), zeros(C2), zeros(C2), ones(C2),
        w3, zeros(1),
    )


def decoder_reference(h, params):
    """Un-fused, un-folded f32 reference matching the PyTorch eval forward."""
    (w1, b1, g1, bt1, rm1, rv1,
     w2, b2, g2, bt2, rm2, rv2,
     w3, b3) = params
    lrelu = lambda x: jnp.where(x >= 0, x, NEG_SLOPE * x)
    z = lrelu(h @ w1.T + b1)
    z = (z - rm1) / jnp.sqrt(rv1 + EPS) * g1 + bt1
    z = lrelu(z @ w2.T + b2)
    z = (z - rm2) / jnp.sqrt(rv2 + EPS) * g2 + bt2
    z = z @ w3.T + b3
    return z[:, 0]


if __name__ == "__main__":
    key = jax.random.PRNGKey(0)
    k_h, k_p = jax.random.split(key)

    batch, in_channels = 16, 32
    h = jax.random.normal(k_h, (batch, in_channels), jnp.float32)
    params = make_params(k_p, in_channels)
    ref = decoder_reference(h, params)

    # f32 matmul path: exercises BN folding exactly (tight tolerance).
    out_f32 = jax.block_until_ready(
        decoder_forward(h, params, mm_dtype=jnp.float32))
    assert out_f32.shape == (batch,)
    assert jnp.allclose(out_f32, ref, atol=1e-4, rtol=1e-4), (out_f32, ref)

    # Default bf16 matmul path (MXU full-rate); looser tolerance vs f32 ref.
    out = jax.block_until_ready(decoder_forward(h, params))
    assert out.shape == (batch,)
    assert jnp.allclose(out, ref, atol=5e-2, rtol=5e-2), (out, ref)

    print("KERNEL_OK")
</pallas_src>

<mosaic_0001>
module attributes {stable_mosaic.version = 11 : i64} {
  func.func @decoder_kernel(%arg0: i32, %arg1: memref<8x32xf32, #tpu.memory_space<vmem>>, %arg2: memref<32x16xf32, #tpu.memory_space<vmem>>, %arg3: memref<1x16xf32, #tpu.memory_space<vmem>>, %arg4: memref<16x8xf32, #tpu.memory_space<vmem>>, %arg5: memref<1x8xf32, #tpu.memory_space<vmem>>, %arg6: memref<1x8xf32, #tpu.memory_space<vmem>>, %arg7: memref<1x1xf32, #tpu.memory_space<vmem>>, %arg8: memref<8x1xf32, #tpu.memory_space<vmem>>) attributes {dimension_semantics = [#tpu.dimension_semantics<parallel>], iteration_bounds = array<i64: 2>, scalar_prefetch = 0 : i64, scratch_operands = 0 : i64, tpu.core_type = #tpu.core_type<tc>, window_params = [{transform_indices = @transform_0, window_bounds = array<i64: 8, 32>}, {pipeline_mode = #tpu.pipeline_mode<synchronous>, transform_indices = @transform_1, window_bounds = array<i64: 32, 16>}, {pipeline_mode = #tpu.pipeline_mode<synchronous>, transform_indices = @transform_2, window_bounds = array<i64: 1, 16>}, {pipeline_mode = #tpu.pipeline_mode<synchronous>, transform_indices = @transform_3, window_bounds = array<i64: 16, 8>}, {pipeline_mode = #tpu.pipeline_mode<synchronous>, transform_indices = @transform_4, window_bounds = array<i64: 1, 8>}, {pipeline_mode = #tpu.pipeline_mode<synchronous>, transform_indices = @transform_5, window_bounds = array<i64: 1, 8>}, {pipeline_mode = #tpu.pipeline_mode<synchronous>, transform_indices = @transform_6, window_bounds = array<i64: 1, 1>}, {transform_indices = @transform_7, window_bounds = array<i64: 8, 1>}]} {
    %c0 = arith.constant 0 : index
    %c0_0 = arith.constant 0 : index
    %0 = vector.load %arg1[%c0, %c0_0] : memref<8x32xf32, #tpu.memory_space<vmem>>, vector<8x32xf32>
    %c0_1 = arith.constant 0 : index
    %c0_2 = arith.constant 0 : index
    %1 = vector.load %arg2[%c0_1, %c0_2] : memref<32x16xf32, #tpu.memory_space<vmem>>, vector<32x16xf32>
    %cst = arith.constant dense<0.000000e+00> : vector<8x16xf32>
    %2 = tpu.matmul %0, %1, %cst {dimension_numbers = #tpu.dot_dimension_numbers<[1], [0], [0], [1], [0, 0, 1, 1], [], []>} : vector<8x32xf32>, vector<32x16xf32>, vector<8x16xf32> -> vector<8x16xf32>
    %c0_3 = arith.constant 0 : index
    %c0_4 = arith.constant 0 : index
    %3 = vector.load %arg3[%c0_3, %c0_4] : memref<1x16xf32, #tpu.memory_space<vmem>>, vector<1x16xf32>
    %4 = vector.broadcast %3 : vector<1x16xf32> to vector<8x16xf32>
    %5 = arith.addf %2, %4 : vector<8x16xf32>
    %cst_5 = arith.constant 0.000000e+00 : f32
    %6 = vector.broadcast %cst_5 : f32 to vector<8x16xf32>
    %7 = arith.cmpf oge, %5, %6 : vector<8x16xf32>
    %cst_6 = arith.constant 2.000000e-01 : f32
    %8 = vector.broadcast %cst_6 : f32 to vector<8x16xf32>
    %9 = arith.mulf %8, %5 : vector<8x16xf32>
    %10 = arith.select %7, %5, %9 : vector<8x16xi1>, vector<8x16xf32>
    %c0_7 = arith.constant 0 : index
    %c0_8 = arith.constant 0 : index
    %11 = vector.load %arg4[%c0_7, %c0_8] : memref<16x8xf32, #tpu.memory_space<vmem>>, vector<16x8xf32>
    %cst_9 = arith.constant dense<0.000000e+00> : vector<8x8xf32>
    %12 = tpu.matmul %10, %11, %cst_9 {dimension_numbers = #tpu.dot_dimension_numbers<[1], [0], [0], [1], [0, 0, 1, 1], [], []>} : vector<8x16xf32>, vector<16x8xf32>, vector<8x8xf32> -> vector<8x8xf32>
    %c0_10 = arith.constant 0 : index
    %c0_11 = arith.constant 0 : index
    %13 = vector.load %arg5[%c0_10, %c0_11] : memref<1x8xf32, #tpu.memory_space<vmem>>, vector<1x8xf32>
    %14 = vector.broadcast %13 : vector<1x8xf32> to vector<8x8xf32>
    %15 = arith.addf %12, %14 : vector<8x8xf32>
    %cst_12 = arith.constant 0.000000e+00 : f32
    %16 = vector.broadcast %cst_12 : f32 to vector<8x8xf32>
    %17 = arith.cmpf oge, %15, %16 : vector<8x8xf32>
    %cst_13 = arith.constant 2.000000e-01 : f32
    %18 = vector.broadcast %cst_13 : f32 to vector<8x8xf32>
    %19 = arith.mulf %18, %15 : vector<8x8xf32>
    %20 = arith.select %17, %15, %19 : vector<8x8xi1>, vector<8x8xf32>
    %c0_14 = arith.constant 0 : index
    %c0_15 = arith.constant 0 : index
    %21 = vector.load %arg6[%c0_14, %c0_15] : memref<1x8xf32, #tpu.memory_space<vmem>>, vector<1x8xf32>
    %22 = vector.broadcast %21 : vector<1x8xf32> to vector<8x8xf32>
    %23 = arith.mulf %20, %22 : vector<8x8xf32>
    %cst_16 = arith.constant dense<0.000000e+00> : vector<8xf32>
    %24 = vector.multi_reduction <add>, %23, %cst_16 [1] : vector<8x8xf32> to vector<8xf32>
    %25 = vector.shape_cast %24 : vector<8xf32> to vector<8x1xf32>
    %c0_17 = arith.constant 0 : index
    %c0_18 = arith.constant 0 : index
    %26 = vector.load %arg7[%c0_17, %c0_18] : memref<1x1xf32, #tpu.memory_space<vmem>>, vector<1x1xf32>
    %27 = vector.broadcast %26 : vector<1x1xf32> to vector<8x1xf32>
    %28 = arith.addf %25, %27 : vector<8x1xf32>
    %c0_19 = arith.constant 0 : index
    %c0_20 = arith.constant 0 : index
    %29 = vector.load %arg8[%c0_19, %c0_20] : memref<8x1xf32, #tpu.memory_space<vmem>>, vector<8x1xf32>
    tpu.vector_store %arg8[%c0_19, %c0_20], %28 {strides = array<i32>} : memref<8x1xf32, #tpu.memory_space<vmem>>, vector<8x1xf32>,
    return
  }
  func.func @transform_0(%arg0: i32) -> (i32, i32) {
    %c0_i32 = arith.constant 0 : i32
    %c0_i32_0 = arith.constant 0 : i32
    return %arg0, %c0_i32 : i32, i32
  }
  func.func @transform_1(%arg0: i32) -> (i32, i32) {
    %c0_i32 = arith.constant 0 : i32
    %c0_i32_0 = arith.constant 0 : i32
    %c0_i32_1 = arith.constant 0 : i32
    return %c0_i32, %c0_i32_0 : i32, i32
  }
  func.func @transform_2(%arg0: i32) -> (i32, i32) {
    %c0_i32 = arith.constant 0 : i32
    %c0_i32_0 = arith.constant 0 : i32
    %c0_i32_1 = arith.constant 0 : i32
    return %c0_i32, %c0_i32_0 : i32, i32
  }
  func.func @transform_3(%arg0: i32) -> (i32, i32) {
    %c0_i32 = arith.constant 0 : i32
    %c0_i32_0 = arith.constant 0 : i32
    %c0_i32_1 = arith.constant 0 : i32
    return %c0_i32, %c0_i32_0 : i32, i32
  }
  func.func @transform_4(%arg0: i32) -> (i32, i32) {
    %c0_i32 = arith.constant 0 : i32
    %c0_i32_0 = arith.constant 0 : i32
    %c0_i32_1 = arith.constant 0 : i32
    return %c0_i32, %c0_i32_0 : i32, i32
  }
  func.func @transform_5(%arg0: i32) -> (i32, i32) {
    %c0_i32 = arith.constant 0 : i32
    %c0_i32_0 = arith.constant 0 : i32
    %c0_i32_1 = arith.constant 0 : i32
    return %c0_i32, %c0_i32_0 : i32, i32
  }
  func.func @transform_6(%arg0: i32) -> (i32, i32) {
    %c0_i32 = arith.constant 0 : i32
    %c0_i32_0 = arith.constant 0 : i32
    %c0_i32_1 = arith.constant 0 : i32
    return %c0_i32, %c0_i32_0 : i32, i32
  }
  func.func @transform_7(%arg0: i32) -> (i32, i32) {
    %c0_i32 = arith.constant 0 : i32
    %c0_i32_0 = arith.constant 0 : i32
    return %arg0, %c0_i32 : i32, i32
  }
}

</mosaic_0001>

<bundles_post_ra>
// kernel: tpu_custom_call.1
= control target key start
LH: loop header
LB: loop body
LE: loop exit
PB: predicated region body
PF: predicated region fallthrough
CT: control target
= control target key end

     0   :  { %s641_s26 = smov 0   ;;  %s692_s0 = inlined_call_operand.vmem [shape: f32[16,32], index: 0, kind: input, shape index: {}]   ;;  %s693_s1 = inlined_call_operand.vmem [shape: f32[32,16], index: 1, kind: input, shape index: {}]   ;;  %s694_s2 = inlined_call_operand.vmem [shape: f32[1,16], index: 2, kind: input, shape index: {}]   ;;  %s695_s3 = inlined_call_operand.vmem [shape: f32[16,8], index: 3, kind: input, shape index: {}]   ;;  %s696_s4 = inlined_call_operand.vmem [shape: f32[1,8], index: 4, kind: input, shape index: {}]   ;;  %s697_s5 = inlined_call_operand.vmem [shape: f32[1,8], index: 5, kind: input, shape index: {}]   ;;  %s698_s6 = inlined_call_operand.<no memory space> [shape: f32[1,1], index: 6, kind: input, shape index: {}]   ;;  %s699_s7 = inlined_call_operand.vmem [shape: f32[16,1], index: 7, kind: output, shape index: {}]  }
   0x1   :  { %v12_v0 = vstv %s698_s6 }
   0x2   :  { %13 = vst [vmem:[#allocation2] sm:$0x1] %v12_v0 }
   0x3 LB: > { %s526_s27 = sadd.s32 4294967295, %s593_s26   ;;  %p530_p0 = scmp.ge.s32.totalorder %s593_s26, 1  ;;  %s593_s26 = sphi %s641_s26, %s19_s26  }
   0x4   : > { %p238_p1 = scmp.lt.s32.totalorder %s593_s26, 3 }
   0x6   : > { %p239_p2 = pnand %p530_p0, %p238_p1 }
   0x7   : > { %v277_v1 = vld [vmem:[%s693_s1] sm:$0xff] (!%p239_p2)  ;;  %v278_v2 = vld [vmem:[%s693_s1 + $0x8] sm:$0xff] (!%p239_p2)  ;;  %v279_v3 = vld [vmem:[%s693_s1 + $0x10] sm:$0xff] (!%p239_p2)  ;;  %v595_v4 = vmov (!%p239_p2), 0.0|0.0   ;;  %vm596_vm0 = vmmov (!%p239_p2), 0   ;;  %v597_v7 = vmov (!%p239_p2), 0.0  }
   0x8   : > { %242 = sbr.rel (%p239_p2) target bundleno = 601 (0x259), region = 48  ;;  %567 = vmatprep.subr.bf16.mxu0 (!%p239_p2), %v595_v4  ;;  %v568_v5 = vpack.c.bf16 (!%p239_p2), %v278_v2, %v277_v1  ;;  %v280_v6 = vld [vmem:[%s693_s1 + $0x18] sm:$0xff] (!%p239_p2)  ;;  %557 = vmatprep.mubr.msk.f32.mxu0 (!%p239_p2), %vm596_vm0, %v597_v7  ;;  %p268_p3 = scmp.lt.s32.totalorder (!%p239_p2), %s526_s27, 1  ;;  %vm288_vm1 = vcmask (!%p239_p2), 261120   ;;  %v365_v10 = vld [vmem:[%s695_s3] sm:$0xff] (!%p239_p2)  ;;  %v366_v11 = vld [vmem:[%s695_s3 + $0x8] sm:$0xff] (!%p239_p2) }
   0x9   : > { %573 = vmatprep.subr.bf16.mxu1 (!%p239_p2), %v595_v4  ;;  %564 = vmatprep.mubr.msk.f32.mxu1 (!%p239_p2), %vm596_vm0, %v597_v7  ;;  %v571_v8 = vpack.c.bf16 (!%p239_p2), %v280_v6, %v279_v3  ;;  %v574_v12 = vpack.c.bf16 (!%p239_p2), %v366_v11, %v365_v10  ;;  %v533_v13 = vld [vmem:[%s694_s2] ss:$0 sm:$0xff] (!%p239_p2)  ;;  %vm374_vm3 = vcmask (!%p239_p2), 130048   ;;  %vm459_vm5 = vcmask (!%p239_p2), 64512  }
   0xa   : > { %569 = vmatpush3.bf16.msra.mxu0 (!%p239_p2), %v568_v5  ;;  %v535_v19 = vld [vmem:[%s696_s4] ss:$0 sm:$0xff] (!%p239_p2)  ;;  %vm471_vm6 = vcmask (!%p239_p2), 7168  }
   0xb   : > { %570 = vmatprep.subr.bf16.mxu0 (!%p239_p2), %v595_v4  ;;  %575 = vmatpush3.bf16.msra.mxu1 (!%p239_p2), %v574_v12  ;;  %v537_v24 = vld [vmem:[%s697_s5] ss:$0 sm:$0xff] (!%p239_p2) }
   0xc   : > { %v538_v28 = vld [vmem:[#allocation2] ss:$0 sm:$0xff] (!%p239_p2) }
   0xe   : > { %572 = vmatpush3.bf16.msra.mxu0 (!%p239_p2), %v571_v8 }
   0xf   : > { %s701_s27 = smov (!%p268_p3, %s526_s27), 1 }
  0x10   : > { %s531_s12 = sshll.u32 %s701_s27, 3 }
  0x11   : > { %s271_s15 = scalar_lea.vmem %s692_s0, %s531_s12  ;;  %s275_s6 = scalar_lea.vmem %s699_s7, %s531_s12 }
  0x12   : > { %v276_v9 = vld [vmem:[%s271_s15] sm:$0xff] }
  0x13   : > { %558 = vmatmul.mubr.msk.f32.vlgmr.msra.gmra.mrb[0].mxu0 %vm288_vm1, %v276_v9 }
  0xe6   : > { %v358_v14 = vpop.f32.mrb[0].mxu0 }
  0xe7   : > { %v359_v15 = vadd.f32 %v533_v13, %v358_v14  ;;  %v559_v16 = vpop.f32.mrb[1].mxu0 }
  0xe9   : > { %vm362_vm2 = vcmp.ge.f32.partialorder %v359_v15, 0.0  ;;  %v363_v17 = vmul.f32 0.2, %v359_v15 }
  0xeb   : > { %v364_v18 = vsel %vm362_vm2, %v359_v15, %v363_v17 }
  0xec   : > { %565 = vmatmul.mubr.msk.f32.vlgmr.msra.gmra.mrb[0].mxu1 %vm374_vm3, %v364_v18 }
 0x1bf   : > { %v444_v20 = vpop.f32.mrb[0].mxu1 }
 0x1c0   : > { %v445_v21 = vadd.f32 %v535_v19, %v444_v20  ;;  %v566_v22 = vpop.f32.mrb[1].mxu1 }
 0x1c2   : > { %v449_v23 = vmul.f32 0.2, %v445_v21  ;;  %vm448_vm4 = vcmp.ge.f32.partialorder %v445_v21, 0.0 }
 0x1c4   : > { %v450_v25 = vsel %vm448_vm4, %v445_v21, %v449_v23 }
 0x1c5   : > { %v458_v26 = vmul.f32 %v537_v24, %v450_v25 }
 0x1c7   : > { %v460_v27 = vsel %vm459_vm5, %v458_v26, 0.0 }
 0x1c8   : > { %461 = vadd.xlane.f32.xlu0 %v460_v27 }
 0x255   : > { %v462_v29 = vpop.xlane.xlu0 %461 }
 0x256   : > { %v470_v30 = vadd.f32 %v538_v28, %v462_v29 }
 0x258   : > { %472 = vst.msk [vmem:[%s275_s6] sm:$0xff] %vm471_vm6, %v470_v30 }
 0x259 PF: > { %s19_s26 = sadd.s32 1, %s593_s26  }
 0x25a   : > { %p16_p4 = scmp.ge.s32.totalorder %s19_s26, 4  }
 0x25c   :  { %18 = sbr.rel (!%p16_p4) target bundleno = 3 (0x3), region = 78 }

</bundles_post_ra>
